<compile_context>
chip_gen: v6e
topology: v6e:2x2x1
jax: 0.10.0
libtpu: 0.0.40
codegen_flags: <defaults>
</compile_context>

<pallas_src>
import functools

import jax
import jax.numpy as jnp
from jax import lax
from jax.experimental import pallas as pl
from jax.experimental.pallas import tpu as pltpu


def _round_up(x, m):
    return (x + m - 1) // m * m


def _bge_kernel(ids_ref, emb_ref, w1_ref, w2_ref, out_ref, x_ref, *, block_b):
    """One grid step = `block_b` batch rows (sublane-dense).

    ids_ref : SMEM (Bp,) int32      -- scalar-prefetched token id of the pooled (last) position
    emb_ref : VMEM (Vp, Hp) f32     -- resident embedding table
    w1_ref  : VMEM (Hp, Fp) bf16    -- resident weights
    w2_ref  : VMEM (Fp, Hp) bf16
    out_ref : VMEM (block_b, Hp) f32
    x_ref   : VMEM (block_b, Hp) f32 scratch -- gathered last-token embeddings
    """
    g = pl.program_id(0)
    base = g * block_b

    # Fused embedding lookup of the pooled token for each of the block_b rows.
    for i in range(block_b):                       # static unroll, block_b is small
        tok = ids_ref[base + i]
        x_ref[pl.ds(i, 1), :] = emb_ref[pl.ds(tok, 1), :]

    # Synthetic position-wise encoder on the pooled tokens only (bf16 MXU, f32 accumulate).
    x = x_ref[...].astype(jnp.bfloat16)                                   # (TB, Hp)
    h1 = jnp.dot(x, w1_ref[...], preferred_element_type=jnp.float32)      # (TB, Fp) f32
    h1 = jax.nn.gelu(h1)                                                  # f32 VPU/EUP
    h2 = jnp.dot(h1.astype(jnp.bfloat16), w2_ref[...],
                 preferred_element_type=jnp.float32)                      # (TB, Hp) f32

    # F.normalize(p=2, dim=1): x * rsqrt(max(sum(x^2), eps^2)) == x / max(||x||, eps).
    sq = jnp.sum(h2 * h2, axis=-1, keepdims=True)                         # (TB, 1)
    inv = lax.rsqrt(jnp.maximum(sq, 1e-24))
    out_ref[...] = (h2 * inv).astype(out_ref.dtype)


def bge_forward(input_ids, attention_mask, emb_table, w1, w2, *, block_b=8):
    B, S = input_ids.shape
    V, H = emb_table.shape
    F = w1.shape[1]

    # _last_token_pool index computation (tiny XLA scalar work): clamp to >= 0 so an all-zero
    # mask row never produces a negative dynamic slice inside the kernel.
    seqlens = jnp.maximum(jnp.sum(attention_mask.astype(jnp.int32), axis=1) - 1, 0)
    last_ids = input_ids[jnp.arange(B), seqlens].astype(jnp.int32)        # (B,)

    # Pad to lane/sublane-dense shapes (padding columns are zero => norm/matmuls unchanged).
    Hp = _round_up(H, 128)
    Fp = _round_up(F, 128)
    Vp = _round_up(V, 8)
    Bp = _round_up(B, block_b)

    emb_p = jnp.zeros((Vp, Hp), jnp.float32).at[:V, :H].set(emb_table.astype(jnp.float32))
    w1_p = jnp.zeros((Hp, Fp), jnp.bfloat16).at[:H, :F].set(w1.astype(jnp.bfloat16))
    w2_p = jnp.zeros((Fp, Hp), jnp.bfloat16).at[:F, :H].set(w2.astype(jnp.bfloat16))
    ids_p = jnp.zeros((Bp,), jnp.int32).at[:B].set(last_ids)

    kernel = functools.partial(_bge_kernel, block_b=block_b)

    out = pl.pallas_call(
        kernel,
        out_shape=jax.ShapeDtypeStruct((Bp, Hp), jnp.float32),
        grid_spec=pltpu.PrefetchScalarGridSpec(
            num_scalar_prefetch=1,                      # last-token ids -> SMEM (one sld each)
            grid=(Bp // block_b,),
            in_specs=[
                # Resident operands (constant index maps). At these sizes default double
                # buffering is ~100 KiB total; for huge weights use pipeline_mode=pl.Buffered(1).
                pl.BlockSpec((Vp, Hp), lambda g, ids: (0, 0)),   # embedding table
                pl.BlockSpec((Hp, Fp), lambda g, ids: (0, 0)),   # W1
                pl.BlockSpec((Fp, Hp), lambda g, ids: (0, 0)),   # W2
            ],
            out_specs=pl.BlockSpec((block_b, Hp), lambda g, ids: (g, 0)),
            scratch_shapes=[pltpu.VMEM((block_b, Hp), jnp.float32)],
        ),
        compiler_params=pltpu.CompilerParams(
            dimension_semantics=("parallel",),          # >=2 grid steps -> both v7x TCs busy
            vmem_limit_bytes=32 * 1024 * 1024,
        ),
    )(ids_p, emb_p, w1_p, w2_p)

    return out[:B, :H]                                               # (B, H)


def bge_forward_ref(input_ids, attention_mask, emb_table, w1, w2):
    """Pure-JAX reference mirroring BGEModelWrapper.forward semantics with the synthetic
    position-wise encoder (same bf16 matmul precision as the kernel)."""
    x = emb_table[input_ids].astype(jnp.bfloat16)                         # (B, S, H)
    h1 = jnp.einsum("bsh,hf->bsf", x, w1.astype(jnp.bfloat16),
                    preferred_element_type=jnp.float32)
    h1 = jax.nn.gelu(h1)
    h = jnp.einsum("bsf,fh->bsh", h1.astype(jnp.bfloat16), w2.astype(jnp.bfloat16),
                   preferred_element_type=jnp.float32)                    # (B, S, H)
    seqlens = jnp.maximum(jnp.sum(attention_mask, axis=1) - 1, 0)
    last = h[jnp.arange(input_ids.shape[0]), seqlens]                     # (B, H)
    nrm = jnp.maximum(jnp.sqrt(jnp.sum(last * last, axis=1, keepdims=True)), 1e-12)
    return last / nrm


if __name__ == "__main__":
    B, S, H, F, V = 16, 8, 32, 64, 64

    key = jax.random.PRNGKey(0)
    k_emb, k_w1, k_w2, k_ids, k_len = jax.random.split(key, 5)

    emb_table = jax.random.normal(k_emb, (V, H), dtype=jnp.float32) * 0.1
    w1 = jax.random.normal(k_w1, (H, F), dtype=jnp.float32) * 0.1
    w2 = jax.random.normal(k_w2, (F, H), dtype=jnp.float32) * 0.1

    input_ids = jax.random.randint(k_ids, (B, S), 0, V, dtype=jnp.int32)
    # Ragged, right-padded attention masks (lengths in [1, S]).
    lengths = jax.random.randint(k_len, (B,), 1, S + 1)
    attention_mask = (jnp.arange(S)[None, :] < lengths[:, None]).astype(jnp.int32)

    out = jax.block_until_ready(bge_forward(input_ids, attention_mask, emb_table, w1, w2))
    ref = bge_forward_ref(input_ids, attention_mask, emb_table, w1, w2)

    assert out.shape == (B, H)
    assert jnp.allclose(out, ref, atol=2e-3, rtol=2e-3), "mismatch vs reference"
    # Embeddings must be unit-norm.
    assert jnp.allclose(jnp.linalg.norm(out, axis=1), 1.0, atol=1e-3)

    print("KERNEL_OK")
</pallas_src>

<mosaic_0001>
module attributes {stable_mosaic.version = 11 : i64} {
  func.func @_bge_kernel(%arg0: i32, %arg1: memref<16xi32, #tpu.memory_space<smem>>, %arg2: memref<64x128xf32, #tpu.memory_space<vmem>>, %arg3: memref<128x128xbf16, #tpu.memory_space<vmem>>, %arg4: memref<128x128xbf16, #tpu.memory_space<vmem>>, %arg5: memref<8x128xf32, #tpu.memory_space<vmem>>, %arg6: memref<8x128xf32, #tpu.memory_space<vmem>>) attributes {dimension_semantics = [#tpu.dimension_semantics<parallel>], iteration_bounds = array<i64: 2>, scalar_prefetch = 1 : i64, scratch_operands = 1 : i64, tpu.core_type = #tpu.core_type<tc>, window_params = [{pipeline_mode = #tpu.pipeline_mode<synchronous>, transform_indices = @transform_0, window_bounds = array<i64: 64, 128>}, {pipeline_mode = #tpu.pipeline_mode<synchronous>, transform_indices = @transform_1, window_bounds = array<i64: 128, 128>}, {pipeline_mode = #tpu.pipeline_mode<synchronous>, transform_indices = @transform_2, window_bounds = array<i64: 128, 128>}, {transform_indices = @transform_3, window_bounds = array<i64: 8, 128>}]} {
    %c8_i32 = arith.constant 8 : i32
    %0 = arith.muli %arg0, %c8_i32 : i32
    %c0_i32 = arith.constant 0 : i32
    %1 = arith.addi %0, %c0_i32 : i32
    %2 = arith.index_cast %1 : i32 to index
    %3 = memref.load %arg1[%2] : memref<16xi32, #tpu.memory_space<smem>>
    %4 = arith.index_cast %3 : i32 to index
    %c0 = arith.constant 0 : index
    %5 = vector.load %arg2[%4, %c0] : memref<64x128xf32, #tpu.memory_space<vmem>>, vector<1x128xf32>
    %c0_0 = arith.constant 0 : index
    %c0_1 = arith.constant 0 : index
    %6 = vector.load %arg6[%c0_0, %c0_1] : memref<8x128xf32, #tpu.memory_space<vmem>>, vector<1x128xf32>
    tpu.vector_store %arg6[%c0_0, %c0_1], %5 {strides = array<i32>} : memref<8x128xf32, #tpu.memory_space<vmem>>, vector<1x128xf32>,
    %c1_i32 = arith.constant 1 : i32
    %7 = arith.addi %0, %c1_i32 : i32
    %8 = arith.index_cast %7 : i32 to index
    %9 = memref.load %arg1[%8] : memref<16xi32, #tpu.memory_space<smem>>
    %10 = arith.index_cast %9 : i32 to index
    %c0_2 = arith.constant 0 : index
    %11 = vector.load %arg2[%10, %c0_2] : memref<64x128xf32, #tpu.memory_space<vmem>>, vector<1x128xf32>
    %c1 = arith.constant 1 : index
    %c0_3 = arith.constant 0 : index
    %12 = vector.load %arg6[%c1, %c0_3] : memref<8x128xf32, #tpu.memory_space<vmem>>, vector<1x128xf32>
    tpu.vector_store %arg6[%c1, %c0_3], %11 {strides = array<i32>} : memref<8x128xf32, #tpu.memory_space<vmem>>, vector<1x128xf32>,
    %c2_i32 = arith.constant 2 : i32
    %13 = arith.addi %0, %c2_i32 : i32
    %14 = arith.index_cast %13 : i32 to index
    %15 = memref.load %arg1[%14] : memref<16xi32, #tpu.memory_space<smem>>
    %16 = arith.index_cast %15 : i32 to index
    %c0_4 = arith.constant 0 : index
    %17 = vector.load %arg2[%16, %c0_4] : memref<64x128xf32, #tpu.memory_space<vmem>>, vector<1x128xf32>
    %c2 = arith.constant 2 : index
    %c0_5 = arith.constant 0 : index
    %18 = vector.load %arg6[%c2, %c0_5] : memref<8x128xf32, #tpu.memory_space<vmem>>, vector<1x128xf32>
    tpu.vector_store %arg6[%c2, %c0_5], %17 {strides = array<i32>} : memref<8x128xf32, #tpu.memory_space<vmem>>, vector<1x128xf32>,
    %c3_i32 = arith.constant 3 : i32
    %19 = arith.addi %0, %c3_i32 : i32
    %20 = arith.index_cast %19 : i32 to index
    %21 = memref.load %arg1[%20] : memref<16xi32, #tpu.memory_space<smem>>
    %22 = arith.index_cast %21 : i32 to index
    %c0_6 = arith.constant 0 : index
    %23 = vector.load %arg2[%22, %c0_6] : memref<64x128xf32, #tpu.memory_space<vmem>>, vector<1x128xf32>
    %c3 = arith.constant 3 : index
    %c0_7 = arith.constant 0 : index
    %24 = vector.load %arg6[%c3, %c0_7] : memref<8x128xf32, #tpu.memory_space<vmem>>, vector<1x128xf32>
    tpu.vector_store %arg6[%c3, %c0_7], %23 {strides = array<i32>} : memref<8x128xf32, #tpu.memory_space<vmem>>, vector<1x128xf32>,
    %c4_i32 = arith.constant 4 : i32
    %25 = arith.addi %0, %c4_i32 : i32
    %26 = arith.index_cast %25 : i32 to index
    %27 = memref.load %arg1[%26] : memref<16xi32, #tpu.memory_space<smem>>
    %28 = arith.index_cast %27 : i32 to index
    %c0_8 = arith.constant 0 : index
    %29 = vector.load %arg2[%28, %c0_8] : memref<64x128xf32, #tpu.memory_space<vmem>>, vector<1x128xf32>
    %c4 = arith.constant 4 : index
    %c0_9 = arith.constant 0 : index
    %30 = vector.load %arg6[%c4, %c0_9] : memref<8x128xf32, #tpu.memory_space<vmem>>, vector<1x128xf32>
    tpu.vector_store %arg6[%c4, %c0_9], %29 {strides = array<i32>} : memref<8x128xf32, #tpu.memory_space<vmem>>, vector<1x128xf32>,
    %c5_i32 = arith.constant 5 : i32
    %31 = arith.addi %0, %c5_i32 : i32
    %32 = arith.index_cast %31 : i32 to index
    %33 = memref.load %arg1[%32] : memref<16xi32, #tpu.memory_space<smem>>
    %34 = arith.index_cast %33 : i32 to index
    %c0_10 = arith.constant 0 : index
    %35 = vector.load %arg2[%34, %c0_10] : memref<64x128xf32, #tpu.memory_space<vmem>>, vector<1x128xf32>
    %c5 = arith.constant 5 : index
    %c0_11 = arith.constant 0 : index
    %36 = vector.load %arg6[%c5, %c0_11] : memref<8x128xf32, #tpu.memory_space<vmem>>, vector<1x128xf32>
    tpu.vector_store %arg6[%c5, %c0_11], %35 {strides = array<i32>} : memref<8x128xf32, #tpu.memory_space<vmem>>, vector<1x128xf32>,
    %c6_i32 = arith.constant 6 : i32
    %37 = arith.addi %0, %c6_i32 : i32
    %38 = arith.index_cast %37 : i32 to index
    %39 = memref.load %arg1[%38] : memref<16xi32, #tpu.memory_space<smem>>
    %40 = arith.index_cast %39 : i32 to index
    %c0_12 = arith.constant 0 : index
    %41 = vector.load %arg2[%40, %c0_12] : memref<64x128xf32, #tpu.memory_space<vmem>>, vector<1x128xf32>
    %c6 = arith.constant 6 : index
    %c0_13 = arith.constant 0 : index
    %42 = vector.load %arg6[%c6, %c0_13] : memref<8x128xf32, #tpu.memory_space<vmem>>, vector<1x128xf32>
    tpu.vector_store %arg6[%c6, %c0_13], %41 {strides = array<i32>} : memref<8x128xf32, #tpu.memory_space<vmem>>, vector<1x128xf32>,
    %c7_i32 = arith.constant 7 : i32
    %43 = arith.addi %0, %c7_i32 : i32
    %44 = arith.index_cast %43 : i32 to index
    %45 = memref.load %arg1[%44] : memref<16xi32, #tpu.memory_space<smem>>
    %46 = arith.index_cast %45 : i32 to index
    %c0_14 = arith.constant 0 : index
    %47 = vector.load %arg2[%46, %c0_14] : memref<64x128xf32, #tpu.memory_space<vmem>>, vector<1x128xf32>
    %c7 = arith.constant 7 : index
    %c0_15 = arith.constant 0 : index
    %48 = vector.load %arg6[%c7, %c0_15] : memref<8x128xf32, #tpu.memory_space<vmem>>, vector<1x128xf32>
    tpu.vector_store %arg6[%c7, %c0_15], %47 {strides = array<i32>} : memref<8x128xf32, #tpu.memory_space<vmem>>, vector<1x128xf32>,
    %c0_16 = arith.constant 0 : index
    %c0_17 = arith.constant 0 : index
    %49 = vector.load %arg6[%c0_16, %c0_17] : memref<8x128xf32, #tpu.memory_space<vmem>>, vector<8x128xf32>
    %50 = arith.truncf %49 : vector<8x128xf32> to vector<8x128xbf16>
    %c0_18 = arith.constant 0 : index
    %c0_19 = arith.constant 0 : index
    %51 = vector.load %arg3[%c0_18, %c0_19] : memref<128x128xbf16, #tpu.memory_space<vmem>>, vector<128x128xbf16>
    %cst = arith.constant dense<0.000000e+00> : vector<8x128xf32>
    %52 = tpu.matmul %50, %51, %cst {dimension_numbers = #tpu.dot_dimension_numbers<[1], [0], [0], [1], [0, 0, 1, 1], [], []>} : vector<8x128xbf16>, vector<128x128xbf16>, vector<8x128xf32> -> vector<8x128xf32>
    %53 = arith.mulf %52, %52 : vector<8x128xf32>
    %54 = arith.mulf %52, %53 : vector<8x128xf32>
    %cst_20 = arith.constant 4.471500e-02 : f32
    %55 = vector.broadcast %cst_20 : f32 to vector<8x128xf32>
    %56 = arith.mulf %55, %54 : vector<8x128xf32>
    %57 = arith.addf %52, %56 : vector<8x128xf32>
    %cst_21 = arith.constant 0.797884583 : f32
    %58 = vector.broadcast %cst_21 : f32 to vector<8x128xf32>
    %59 = arith.mulf %58, %57 : vector<8x128xf32>
    %60 = math.tanh %59 : vector<8x128xf32>
    %cst_22 = arith.constant 1.000000e+00 : f32
    %61 = vector.broadcast %cst_22 : f32 to vector<8x128xf32>
    %62 = arith.addf %61, %60 : vector<8x128xf32>
    %cst_23 = arith.constant 5.000000e-01 : f32
    %63 = vector.broadcast %cst_23 : f32 to vector<8x128xf32>
    %64 = arith.mulf %63, %62 : vector<8x128xf32>
    %65 = arith.mulf %52, %64 : vector<8x128xf32>
    %66 = arith.truncf %65 : vector<8x128xf32> to vector<8x128xbf16>
    %c0_24 = arith.constant 0 : index
    %c0_25 = arith.constant 0 : index
    %67 = vector.load %arg4[%c0_24, %c0_25] : memref<128x128xbf16, #tpu.memory_space<vmem>>, vector<128x128xbf16>
    %cst_26 = arith.constant dense<0.000000e+00> : vector<8x128xf32>
    %68 = tpu.matmul %66, %67, %cst_26 {dimension_numbers = #tpu.dot_dimension_numbers<[1], [0], [0], [1], [0, 0, 1, 1], [], []>} : vector<8x128xbf16>, vector<128x128xbf16>, vector<8x128xf32> -> vector<8x128xf32>
    %69 = arith.mulf %68, %68 : vector<8x128xf32>
    %cst_27 = arith.constant dense<0.000000e+00> : vector<8xf32>
    %70 = vector.multi_reduction <add>, %69, %cst_27 [1] : vector<8x128xf32> to vector<8xf32>
    %71 = vector.shape_cast %70 : vector<8xf32> to vector<8x1xf32>
    %cst_28 = arith.constant 1.000000e-24 : f32
    %72 = vector.broadcast %cst_28 : f32 to vector<8x1xf32>
    %73 = arith.maximumf %71, %72 : vector<8x1xf32>
    %74 = math.rsqrt %73 : vector<8x1xf32>
    %75 = vector.broadcast %74 : vector<8x1xf32> to vector<8x128xf32>
    %76 = arith.mulf %68, %75 : vector<8x128xf32>
    %c0_29 = arith.constant 0 : index
    %c0_30 = arith.constant 0 : index
    %77 = vector.load %arg5[%c0_29, %c0_30] : memref<8x128xf32, #tpu.memory_space<vmem>>, vector<8x128xf32>
    tpu.vector_store %arg5[%c0_29, %c0_30], %76 {strides = array<i32>} : memref<8x128xf32, #tpu.memory_space<vmem>>, vector<8x128xf32>,
    return
  }
  func.func @transform_0(%arg0: i32, %arg1: memref<16xi32, #tpu.memory_space<smem>>) -> (i32, i32) {
    %c0_i32 = arith.constant 0 : i32
    %c0_i32_0 = arith.constant 0 : i32
    %c0_i32_1 = arith.constant 0 : i32
    return %c0_i32, %c0_i32_0 : i32, i32
  }
  func.func @transform_1(%arg0: i32, %arg1: memref<16xi32, #tpu.memory_space<smem>>) -> (i32, i32) {
    %c0_i32 = arith.constant 0 : i32
    %c0_i32_0 = arith.constant 0 : i32
    %c0_i32_1 = arith.constant 0 : i32
    return %c0_i32, %c0_i32_0 : i32, i32
  }
  func.func @transform_2(%arg0: i32, %arg1: memref<16xi32, #tpu.memory_space<smem>>) -> (i32, i32) {
    %c0_i32 = arith.constant 0 : i32
    %c0_i32_0 = arith.constant 0 : i32
    %c0_i32_1 = arith.constant 0 : i32
    return %c0_i32, %c0_i32_0 : i32, i32
  }
  func.func @transform_3(%arg0: i32, %arg1: memref<16xi32, #tpu.memory_space<smem>>) -> (i32, i32) {
    %c0_i32 = arith.constant 0 : i32
    %c0_i32_0 = arith.constant 0 : i32
    return %arg0, %c0_i32 : i32, i32
  }
}

</mosaic_0001>

<bundles_post_ra>
// kernel: tpu_custom_call.1
= control target key start
LH: loop header
LB: loop body
LE: loop exit
PB: predicated region body
PF: predicated region fallthrough
CT: control target
= control target key end

     0   :  { %s910_s15 = smov [#allocation4]   ;;  %s1115_s0 = inlined_call_operand.hbm [shape: s32[16], index: 0, kind: input, shape index: {}]   ;;  %s1116_s1 = inlined_call_operand.hbm [shape: f32[64,128], index: 1, kind: input, shape index: {}]   ;;  %s1117_s2 = inlined_call_operand.hbm [shape: bf16[128,128], index: 2, kind: input, shape index: {}]   ;;  %s1118_s3 = inlined_call_operand.hbm [shape: bf16[128,128], index: 3, kind: input, shape index: {}]   ;;  %s1119_s4 = inlined_call_operand.hbm [shape: f32[16,128], index: 4, kind: output, shape index: {}]  }
   0x1   :  { %10 = dma.hbm_to_smem %s1115_s0, 16, %s910_s15, [#allocation3] }
   0x2   :  { %880 = dma.done.wait [#allocation3], 16 }
   0x3   :  { %881 = vsyncadd [#allocation3], 4294967280 }
   0x4   :  { %12 = sfence }
   0x5   :  { %13 = vsyncpa [#allocation6], 0 }
   0x6   :  { %14 = vsyncpa [#allocation9], 0 }
   0x7   :  { %15 = vsyncpa [#allocation7], 0 }
   0x8   :  { %17 = vsyncpa [#allocation7 + $0x1], 0  ;;  %s949_s18 = smov 0   ;;  %s951_s19 = smov 0  }
   0x9   :  { %s953_s20 = smov 0   ;;  %s955_s21 = smov 0  }
   0xa LB: > { %s970_s0 = sadd.s32 4294967295, %s908_s21   ;;  %s566_s22 = sadd.s32 4294967294, %s908_s21   ;;  %s908_s21 = sphi %s955_s21, %s1127_s21   ;;  %s904_s20 = sphi %s953_s20, %s1126_s20   ;;  %s900_s19 = sphi %s951_s19, %s1125_s19   ;;  %s896_s18 = sphi %s949_s18, %s1124_s18  }
   0xb   : > { %s974_s23 = sadd.s32 1, %s908_s21   ;;  %s93_s24 = sadd.s32 1, %s904_s20 }
   0xc   : > { %s90_s25 = ssub.s32 %s908_s21, %s974_s23  ;;  %p103_p0 = scmp.ne.s32.totalorder %s904_s20, %s900_s19 }
   0xd   : > { %p91_p1 = scmp.eq.s32.totalorder %s90_s25, 0  ;;  %p104_p2 = scmp.eq.s32.totalorder %s970_s0, 1 }
   0xe   : > { %p109_p3 = scmp.ne.s32.totalorder %s900_s19, %s896_s18  ;;  %p110_p4 = scmp.eq.s32.totalorder %s566_s22, 1 }
   0xf   : > { %s985_s26 = scalar_select %p91_p1, %s904_s20, %s93_s24  }
  0x10   : > { %p987_p5 = por %p104_p2, %p103_p0  ;;  %p991_p6 = por %p110_p4, %p109_p3 }
  0x11   : > { %p567_p7 = scmp.ge.s32.totalorder %s908_s21, 1  ;;  %p117_p8 = scmp.lt.s32.totalorder %s908_s21, 3 }
  0x12   : > { %p683_p9 = scmp.eq.s32.totalorder %s970_s0, 0  ;;  %s911_s30 = smov [#allocation8]  }
  0x13   : > { %p998_p10 = pnand %p567_p7, %p117_p8  ;;  %s142_s5 = sshll.u32 %s911_s30, 4  ;;  %s143_s5 = int_to_ptr.vmem [resolvable:$true] %s142_s5 }
  0x14   : > { %s912_s7 = smov [#allocation5]   ;;  %s771_s9 = scalar_lea.vmem %s143_s5, 1024 }
  0x15   : > { %p669_p11 = pneg %p998_p10  ;;  %s129_s8 = sshll.u32 %s912_s7, 4  ;;  %s130_s8 = int_to_ptr.vmem [resolvable:$true] %s129_s8 }
  0x16   : > { %p772_p0 = scmp.ne.s32.totalorder %s143_s5, %s771_s9  ;;  %p779_p3 = scmp.lt.s32.totalorder %s143_s5, %s143_s5 }
  0x17   : > { %p1006_p12 = pnand %p683_p9, %p669_p11  ;;  %p780_p4 = scmp.lt.s32.totalorder %s771_s9, %s771_s9 }
  0x19   : > { %p762_p13 = pneg %p1006_p12  ;;  %p781_p7 = por %p780_p4, %p779_p3 }
  0x1b   : > { %p774_p1 = pnand %p772_p0, %p762_p13 }
  0x1d   : > { %p775_p2 = pneg %p774_p1 }
  0x1f   : > { %p782_p8 = pnand %p781_p7, %p775_p2 }
  0x21   : > { %785 = shalt.err (!%p782_p8)
}
  0x22   : > { %s913_s10 = smov 64   ;;  %s914_s11 = smov 4  }
  0x23   : > { %675 = dma.hbm_to_vmem [thread:$0]  (!%p1006_p12), %s1117_s2, 1024, %s143_s5, [#allocation9], %s913_s10, %s913_s10, %s914_s11  }
  0x24   : > { %s797_s14 = scalar_lea.vmem %s130_s8, 1024  ;;  %p805_p2 = scmp.lt.s32.totalorder %s130_s8, %s130_s8 }
  0x25   : > { %p798_p11 = scmp.ne.s32.totalorder %s130_s8, %s797_s14  ;;  %p806_p3 = scmp.lt.s32.totalorder %s797_s14, %s797_s14 }
  0x27   : > { %p800_p0 = pnand %p798_p11, %p762_p13  ;;  %p807_p4 = por %p806_p3, %p805_p2 }
  0x29   : > { %p801_p1 = pneg %p800_p0 }
  0x2b   : > { %p808_p7 = pnand %p807_p4, %p801_p1 }
  0x2d   : > { %811 = shalt.err (!%p808_p7)
}
  0x2e   : > { %s915_s15 = smov 128   ;;  %s916_s16 = smov 8  }
  0x2f   : > { %672 = dma.hbm_to_vmem [thread:$0]  (!%p1006_p12), %s1116_s1, 1024, %s130_s8, [#allocation6], %s915_s15, %s915_s15, %s916_s16  }
  0x30   : > { %s917_s24 = smov [#allocation10]  }
  0x31   : > { %s155_s25 = sshll.u32 %s917_s24, 4  ;;  %s156_s25 = int_to_ptr.vmem [resolvable:$true] %s155_s25 }
  0x32   : > { %s823_s30 = scalar_lea.vmem %s156_s25, 1024  ;;  %p831_p1 = scmp.lt.s32.totalorder %s156_s25, %s156_s25 }
  0x33   : > { %p824_p8 = scmp.ne.s32.totalorder %s156_s25, %s823_s30  ;;  %p832_p2 = scmp.lt.s32.totalorder %s823_s30, %s823_s30 }
  0x35   : > { %p826_p11 = pnand %p824_p8, %p762_p13  ;;  %p833_p3 = por %p832_p2, %p831_p1 }
  0x37   : > { %p827_p0 = pneg %p826_p11 }
  0x39   : > { %p834_p4 = pnand %p833_p3, %p827_p0 }
  0x3b   : > { %837 = shalt.err (!%p834_p4)
}
  0x3c   : > { %678 = dma.hbm_to_vmem [thread:$0]  (!%p1006_p12), %s1118_s3, 1024, %s156_s25, [#allocation9], %s913_s10, %s913_s10, %s914_s11  }
  0x3d   : > { %171 = sbr.rel (%p998_p10) target bundleno = 692 (0x2b4), region = 32 }
  0x42   : > { %883 = dma.done.wait (%p683_p9), [#allocation6], 1024  }
  0x43   : > { %885 = vsyncadd (%p683_p9), [#allocation6], 4294966272 }
  0x44   : > { %887 = dma.done.wait (%p683_p9), [#allocation9], 2048  }
  0x45   : > { %889 = vsyncadd (%p683_p9), [#allocation9], 4294965248  ;;  %s1053_s6 = sshll.u32 %s970_s0, 3  ;;  %v918_v0 = vmov 0.0   ;;  %vm919_vm0 = vmmov 0   ;;  %v732_v1 = vld [vmem:[#allocation8 + $0x38] sm:$0xff]  }
  0x46   : > { %615 = vmatprep.subr.bf16.mxu0 %v918_v0  ;;  %631 = vmatprep.mubr.msk.bf16.mxu0 %vm919_vm0, %v918_v0  ;;  %s200_s29 = sld [smem:[#allocation4 + %s1053_s6]]  ;;  %s204_s8 = sadd.s32 1, %s1053_s6  ;;  %v733_v2 = vld [vmem:[#allocation8 + $0x30] sm:$0xff]   ;;  %v734_v3 = vld [vmem:[#allocation8 + $0x28] sm:$0xff]   ;;  %v735_v10 = vld [vmem:[#allocation8 + $0x20] sm:$0xff]  }
  0x47   : > { %s205_s9 = sld [smem:[#allocation4 + %s204_s8]]  ;;  %s209_s10 = sadd.s32 2, %s1053_s6  ;;  %635 = vmatprep.subr.bf16.mxu1 %v918_v0  ;;  %651 = vmatprep.mubr.msk.bf16.mxu1 %vm919_vm0, %v918_v0  ;;  %v736_v11 = vld [vmem:[#allocation8 + $0x18] sm:$0xff]   ;;  %v737_v14 = vld [vmem:[#allocation8 + $0x10] sm:$0xff]   ;;  %v738_v15 = vld [vmem:[#allocation8 + $0x8] sm:$0xff]  }
  0x48   : > { %s210_s11 = sld [smem:[#allocation4 + %s209_s10]]  ;;  %s214_s12 = sadd.s32 3, %s1053_s6  ;;  %616 = vmatpush3.bf16.msra.mxu0 %v732_v1  ;;  %v739_v16 = vld [vmem:[#allocation8] sm:$0xff]   ;;  %v740_v19 = vld [vmem:[#allocation10 + $0x38] sm:$0xff]   ;;  %v741_v20 = vld [vmem:[#allocation10 + $0x30] sm:$0xff]  }
  0x49   : > { %s215_s13 = sld [smem:[#allocation4 + %s214_s12]]  ;;  %s219_s14 = sadd.s32 4, %s1053_s6  ;;  %617 = vmatprep.subr.bf16.mxu0 %v918_v0  ;;  %636 = vmatpush3.bf16.msra.mxu1 %v740_v19  ;;  %v742_v21 = vld [vmem:[#allocation10 + $0x28] sm:$0xff]   ;;  %v743_v22 = vld [vmem:[#allocation10 + $0x20] sm:$0xff]   ;;  %v744_v23 = vld [vmem:[#allocation10 + $0x18] sm:$0xff]  }
  0x4a   : > { %s220_s15 = sld [smem:[#allocation4 + %s219_s14]]  ;;  %s224_s16 = sadd.s32 5, %s1053_s6  ;;  %637 = vmatprep.subr.bf16.mxu1 %v918_v0  ;;  %v745_v24 = vld [vmem:[#allocation10 + $0x10] sm:$0xff]   ;;  %v746_v25 = vld [vmem:[#allocation10 + $0x8] sm:$0xff]   ;;  %v747_v26 = vld [vmem:[#allocation10] sm:$0xff]  }
  0x4b   : > { %s225_s17 = sld [smem:[#allocation4 + %s224_s16]]  ;;  %s229_s22 = sadd.s32 6, %s1053_s6 }
  0x4c   : > { %618 = vmatpush3.bf16.msra.mxu0 %v733_v2  ;;  %s230_s24 = sld [smem:[#allocation4 + %s229_s22]]  ;;  %s234_s25 = sadd.s32 7, %s1053_s6 }
  0x4d   : > { %619 = vmatprep.subr.bf16.mxu0 %v918_v0  ;;  %s201_s30 = scalar_lea.vmem [#allocation5], %s200_s29  ;;  %s206_s5 = scalar_lea.vmem [#allocation5], %s205_s9  ;;  %638 = vmatpush3.bf16.msra.mxu1 %v741_v20 }
  0x4e   : > { %v202_v4 = vld [vmem:[%s201_s30] sm:$0x1]  ;;  %s211_s7 = scalar_lea.vmem [#allocation5], %s210_s11  ;;  %s235_s6 = sld [smem:[#allocation4 + %s234_s25]]  ;;  %639 = vmatprep.subr.bf16.mxu1 %v918_v0 }
  0x4f   : > { %v207_v5 = vld [vmem:[%s206_s5] sm:$0x1]  ;;  %203 = vst [vmem:[#allocation2] sm:$0x1] %v202_v4  ;;  %s216_s8 = scalar_lea.vmem [#allocation5], %s215_s13  ;;  %s195_s11 = sand.u32 1, %s900_s19  }
  0x50   : > { %v212_v6 = vld [vmem:[%s211_s7] sm:$0x1]  ;;  %208 = vst [vmem:[#allocation2 + $0x1] sm:$0x1] %v207_v5  ;;  %s221_s10 = scalar_lea.vmem [#allocation5], %s220_s15  ;;  %620 = vmatpush3.bf16.msra.mxu0 %v734_v3  ;;  %s575_s13 = sshll.u32 %s195_s11, 3 }
  0x51   : > { %213 = vst [vmem:[#allocation2 + $0x2] sm:$0x1] %v212_v6  ;;  %v217_v7 = vld [vmem:[%s216_s8] sm:$0x1]  ;;  %s226_s12 = scalar_lea.vmem [#allocation5], %s225_s17  ;;  %621 = vmatprep.subr.bf16.mxu0 %v918_v0  ;;  %640 = vmatpush3.bf16.msra.mxu1 %v742_v21  ;;  %s594_s14 = sshll.u32 %s970_s0, 7 }
  0x52   : > { %v222_v8 = vld [vmem:[%s221_s10] sm:$0x1]  ;;  %218 = vst [vmem:[#allocation2 + $0x3] sm:$0x1] %v217_v7  ;;  %s231_s29 = scalar_lea.vmem [#allocation5], %s230_s24  ;;  %641 = vmatprep.subr.bf16.mxu1 %v918_v0  ;;  %s197_s15 = scalar_lea.vmem [#allocation11], %s575_s13 }
  0x53   : > { %v227_v9 = vld [vmem:[%s226_s12] sm:$0x1]  ;;  %223 = vst [vmem:[#allocation2 + $0x4] sm:$0x1] %v222_v8  ;;  %s480_s16 = sshll.u32 %s197_s15, 4  ;;  %s478_s24 = scalar_lea.hbm %s1119_s4, %s594_s14  ;;  %s481_s16 = int_to_ptr.vmem [resolvable:$true] %s480_s16 }
  0x54   : > { %228 = vst [vmem:[#allocation2 + $0x5] sm:$0x1] %v227_v9  ;;  %v232_v12 = vld [vmem:[%s231_s29] sm:$0x1]  ;;  %622 = vmatpush3.bf16.msra.mxu0 %v735_v10  ;;  %s236_s9 = scalar_lea.vmem [#allocation5], %s235_s6  ;;  %s467_s25 = scalar_lea.sflag [#allocation7], %s195_s11 }
  0x55   : > { %233 = vst [vmem:[#allocation2 + $0x6] sm:$0x1] %v232_v12  ;;  %623 = vmatprep.subr.bf16.mxu0 %v918_v0  ;;  %v237_v13 = vld [vmem:[%s236_s9] sm:$0x1]  ;;  %642 = vmatpush3.bf16.msra.mxu1 %v743_v22  ;;  %s838_s30 = scalar_lea.vmem %s481_s16, 128  ;;  %s920_s5 = smov [#allocation11]  }
  0x56   : > { %238 = vst [vmem:[#allocation2 + $0x7] sm:$0x1] %v237_v13  ;;  %643 = vmatprep.subr.bf16.mxu1 %v918_v0  ;;  %p839_p9 = scmp.ne.s32.totalorder %s481_s16, %s838_s30  ;;  %s842_s7 = sshll.u32 %s920_s5, 4  ;;  %s843_s7 = int_to_ptr.vmem [resolvable:$false] %s842_s7 }
  0x57   : > { %s844_s0 = scalar_lea.vmem %s843_s7, 256  ;;  %p845_p13 = scmp.lt.s32.totalorder %s481_s16, %s843_s7 }
  0x58   : > { %624 = vmatpush3.bf16.msra.mxu0 %v736_v11  ;;  %p840_p10 = pnand %p839_p9, %p987_p5  ;;  %p846_p7 = scmp.lt.s32.totalorder %s844_s0, %s838_s30 }
  0x59   : > { %625 = vmatprep.subr.bf16.mxu0 %v918_v0  ;;  %644 = vmatpush3.bf16.msra.mxu1 %v744_v23 }
  0x5a   : > { %645 = vmatprep.subr.bf16.mxu1 %v918_v0  ;;  %p841_p12 = pneg %p840_p10  ;;  %p847_p8 = por %p846_p7, %p845_p13 }
  0x5c   : > { %626 = vmatpush3.bf16.msra.mxu0 %v737_v14  ;;  %p848_p11 = pnand %p847_p8, %p841_p12 }
  0x5d   : > { %627 = vmatprep.subr.bf16.mxu0 %v918_v0  ;;  %v239_v17 = vld [vmem:[#allocation2] sm:$0xff]  ;;  %646 = vmatpush3.bf16.msra.mxu1 %v745_v24 }
  0x5e   : > { %v240_v18 = vpack.c.bf16 %v239_v17, %v239_v17  ;;  %647 = vmatprep.subr.bf16.mxu1 %v918_v0 }
  0x60   : > { %628 = vmatpush3.bf16.msra.mxu0 %v738_v15 }
  0x61   : > { %629 = vmatprep.subr.bf16.mxu0 %v918_v0  ;;  %648 = vmatpush3.bf16.msra.mxu1 %v746_v25 }
  0x62   : > { %649 = vmatprep.subr.bf16.mxu1 %v918_v0 }
  0x64   : > { %630 = vmatpush3.bf16.msra.mxu0 %v739_v16 }
  0x65   : > { %650 = vmatpush3.bf16.msra.mxu1 %v747_v26 }
  0x67   : > { %632 = vmatmul.mubr.bf16.vlgmr.msra.gmra.mxu0 %v240_v18 }
 0x127   : > { %v339_v27 = vpop.f32.mrf.mxu0 }
 0x128   : > { %v345_v28 = vmul.f32 %v339_v27, %v339_v27 }
 0x129   : > { %v633_v29 = vpop.f32.mrf.mxu0 }
 0x12a   : > { %v346_v30 = vmul.f32 %v345_v28, %v339_v27 }
 0x12b   : > { %v342_v31 = vpop.f32.mrf.mxu0 }
 0x12c   : > { %v347_v32 = vmul.f32 0.044715, %v346_v30 }
 0x12d   : > { %v634_v33 = vpop.f32.mrf.mxu0 }
 0x12e   : > { %v348_v34 = vadd.f32 %v347_v32, %v339_v27 }
 0x130   : > { %v349_v35 = vmul.f32 0.7978846, %v348_v34 }
 0x132   : > { %748 = vtanh.f32 %v349_v35 }
 0x13f   : > { %v749_v36 = vpop.eup %748 }
 0x140   : > { %v351_v37 = vadd.f32 1.0, %v749_v36 }
 0x142   : > { %v352_v38 = vmul.f32 0.5, %v351_v37 }
 0x144   : > { %v353_v39 = vmul.f32 %v352_v38, %v339_v27 }
 0x146   : > { %v354_v40 = vpack.c.bf16 %v353_v39, %v353_v39 }
 0x148   : > { %652 = vmatmul.mubr.bf16.vlgmr.msra.gmra.mxu1 %v354_v40 }
 0x208   : > { %v453_v41 = vpop.f32.mrf.mxu1 }
 0x209   : > { %v459_v42 = vmul.f32 %v453_v41, %v453_v41 }
 0x20a   : > { %v653_v43 = vpop.f32.mrf.mxu1 }
 0x20b   : > { %460 = vadd.xlane.f32.xlu0 %v459_v42 }
 0x20c   : > { %v456_v44 = vpop.f32.mrf.mxu1 }
 0x20e   : > { %v654_v45 = vpop.f32.mrf.mxu1 }
 0x294   : > { %v461_v46 = vpop.xlane.xlu0 %460 }
 0x295   : > { %v462_v47 = vmax.f32 %v461_v46, 1e-24 }
 0x297   : > { %750 = vrsqrt.f32 %v462_v47 }
 0x2a4   : > { %v751_v48 = vpop.eup %750 }
 0x2a5   : > { %v464_v49 = vmul.f32 %v751_v48, %v453_v41 }
 0x2a7   : > { %465 = vst [vmem:[%s197_s15] sm:$0xff] %v464_v49 }
 0x2a8   : > { %851 = shalt.err (!%p848_p11)
}
 0x2a9   : > { %s852_s8 = scalar_lea.hbm %s478_s24, 128  ;;  %s856_s6 = scalar_lea.hbm %s1119_s4, 256 }
 0x2aa   : > { %p853_p0 = scmp.ne.s32.totalorder %s478_s24, %s852_s8  ;;  %p857_p3 = scmp.lt.s32.totalorder %s478_s24, %s1119_s4 }
 0x2ab   : > { %p858_p4 = scmp.lt.s32.totalorder %s856_s6, %s852_s8 }
 0x2ac   : > { %p854_p1 = pnand %p853_p0, %p987_p5 }
 0x2ad   : > { %p859_p9 = por %p858_p4, %p857_p3 }
 0x2ae   : > { %p855_p2 = pneg %p854_p1 }
 0x2b0   : > { %p860_p10 = pnand %p859_p9, %p855_p2 }
 0x2b2   : > { %863 = shalt.err (!%p860_p10)
}
 0x2b3   : > { %667 = dma.vmem_to_hbm [thread:$0]  (%p987_p5), %s481_s16, 128, %s478_s24, %s467_s25  }
 0x2b4 PF: > { %p689_p12 = scmp.ge.s32.totalorder %s908_s21, 2  ;;  %s492_s11 = sand.u32 1, %s896_s18  }
 0x2b5   : > { %s493_s13 = scalar_lea.sflag [#allocation7], %s492_s11 }
 0x2b6   : > { %p680_p13 = pnand %p689_p12, %p991_p6 }
 0x2b8   : > { %p681_p7 = pneg %p680_p13 }
 0x2ba   : > { %891 = dma.done.wait (%p681_p7), %s493_s13, 128  }
 0x2bb   : > { %893 = vsyncadd (%p681_p7), %s493_s13, 4294967168  ;;  %p20_p8 = scmp.ge.s32.totalorder %s974_s23, 4   ;;  %s1124_s18 = smov %s900_s19 }
 0x2bc   : > { %s1125_s19 = smov %s904_s20  ;;  %s1126_s20 = smov %s985_s26 }
 0x2bd   : > { %s1127_s21 = smov %s974_s23  ;;  %22 = sbr.rel (!%p20_p8) target bundleno = 10 (0xa), region = 85 }
 0x2c2   :  { %498 = vsyncpa [#allocation6], 1 }
 0x2c3   :  { %500 = vsyncpa [#allocation6 + $0x1], 1 }
 0x2c4   :  { %501 = vsyncpa [#allocation9], 1 }
 0x2c5   :  { %502 = vsyncpa [#allocation7], 1 }
 0x2c6   :  { %504 = vsyncpa [#allocation7 + $0x1], 1 }

</bundles_post_ra>
